<compile_context>
chip_gen: v5e
topology: v5e:2x2
jax: 0.10.0
libtpu: 0.0.40
codegen_flags: <defaults>
</compile_context>

<pallas_src>
import jax
import jax.numpy as jnp
from jax.experimental import pallas as pl
from jax.experimental.pallas import tpu as pltpu

K_RAW = 25 * 25      # 625 input features (streamed as-is, no feature padding)
H_RAW = 64
H_PAD = 128          # 64  -> 128  (full vreg lane width / MXU tile)
N_RAW = 10
N_PAD = 128          # logits computed 128-wide in VMEM, stored 10-wide to HBM
NEG_BIG = -1e30      # mask value for padded logit columns


def mlp_kernel(x_ref, w1_ref, b1_ref, w2_ref, b2_ref,
               w3_ref, b3_ref, w4_ref, b4_ref, o_ref):
    # x arrives as f32 straight from HBM; cast to bf16 for the MXU (cheap VPU
    # work hidden inside the pipeline).  All accumulation is f32.
    x = x_ref[...].astype(jnp.bfloat16)
    # fc1 + relu
    h = jnp.dot(x, w1_ref[...], preferred_element_type=jnp.float32)
    h = jnp.maximum(h + b1_ref[...], 0.0)
    # fc2 + relu
    h = jnp.dot(h.astype(w2_ref.dtype), w2_ref[...],
                preferred_element_type=jnp.float32)
    h = jnp.maximum(h + b2_ref[...], 0.0)
    # fc3 + relu
    h = jnp.dot(h.astype(w3_ref.dtype), w3_ref[...],
                preferred_element_type=jnp.float32)
    h = jnp.maximum(h + b3_ref[...], 0.0)
    # fc4
    logits = jnp.dot(h.astype(w4_ref.dtype), w4_ref[...],
                     preferred_element_type=jnp.float32)
    logits = logits + b4_ref[...]
    # Mask padded logit columns so they cannot affect max / logsumexp.
    col = jax.lax.broadcasted_iota(jnp.int32, logits.shape, 1)
    logits = jnp.where(col < N_RAW, logits, NEG_BIG)
    # Numerically stable log_softmax along the last axis (f32).
    m = jnp.max(logits, axis=-1, keepdims=True)
    shifted = logits - m
    lse = jnp.log(jnp.sum(jnp.exp(shifted), axis=-1, keepdims=True))
    # Store only the 10 real logit columns (lane-masked vst in VMEM; the HBM
    # writeback is just 40 B/row instead of 512 B/row).
    o_ref[...] = (shifted - lse)[:, :N_RAW].astype(o_ref.dtype)


def _round_up(x, m):
    return (x + m - 1) // m * m


def _choose_tile_b(b_pad):
    # Aim for >= 4 grid steps (>= 2 pipelined tiles per TensorCore on v7x);
    # cap the tile so double-buffered f32 x tiles stay well inside scoped VMEM.
    return min(2048, max(8, _round_up(pl.cdiv(b_pad, 4), 8)))


@jax.jit
def net_forward(x, params):
    """x: (B, 625) float32. Returns (B, 10) float32 log-probabilities."""
    B, k = x.shape
    assert k == K_RAW

    # Only align the batch axis to the 8-row sublane granule when needed
    # (<= 7 extra rows); no feature padding, no dtype cast in the wrapper.
    b_pad = _round_up(B, 8)
    if b_pad != B:
        x = jnp.pad(x, ((0, b_pad - B), (0, 0)))

    tile_b = _choose_tile_b(b_pad)
    grid = (pl.cdiv(b_pad, tile_b),)   # last block may be partial; writes masked

    w1, b1 = params["w1"], params["b1"]
    w2, b2 = params["w2"], params["b2"]
    w3, b3 = params["w3"], params["b3"]
    w4, b4 = params["w4"], params["b4"]

    const = lambda i: (0, 0)  # weights/biases stay VMEM-resident across the grid

    weight_bytes = sum(int(p.size) * p.dtype.itemsize for p in params.values())
    cost = pl.CostEstimate(
        flops=2 * b_pad * (K_RAW * H_PAD + 2 * H_PAD * H_PAD + H_PAD * N_PAD),
        transcendentals=b_pad * N_PAD,
        bytes_accessed=b_pad * K_RAW * 4 + b_pad * N_RAW * 4 + weight_bytes,
    )

    out = pl.pallas_call(
        mlp_kernel,
        out_shape=jax.ShapeDtypeStruct((b_pad, N_RAW), jnp.float32),
        grid=grid,
        in_specs=[
            pl.BlockSpec((tile_b, K_RAW), lambda i: (i, 0)),   # x tile (streamed f32)
            pl.BlockSpec((K_RAW, H_PAD), const),               # w1 (resident, bf16)
            pl.BlockSpec((1, H_PAD), const),                   # b1 (f32)
            pl.BlockSpec((H_PAD, H_PAD), const),               # w2
            pl.BlockSpec((1, H_PAD), const),                   # b2
            pl.BlockSpec((H_PAD, H_PAD), const),               # w3
            pl.BlockSpec((1, H_PAD), const),                   # b3
            pl.BlockSpec((H_PAD, N_PAD), const),               # w4
            pl.BlockSpec((1, N_PAD), const),                   # b4
        ],
        out_specs=pl.BlockSpec((tile_b, N_RAW), lambda i: (i, 0)),
        compiler_params=pltpu.CompilerParams(
            dimension_semantics=("parallel",),
            vmem_limit_bytes=32 * 1024 * 1024),
        cost_estimate=cost,
    )(x, w1, b1, w2, b2, w3, b3, w4, b4)

    return out if b_pad == B else out[:B]


def init_params(key):
    """PyTorch-Linear-style init (uniform +/- 1/sqrt(fan_in)).  Weights are
    stored pre-transposed as (in, out), zero-padded on the *output* lanes to
    128 and cast to bf16 for the MXU; biases stay f32 (added post f32-accum).
    w1 keeps its true 625-row input dim (x is streamed unpadded)."""
    raw_sizes = [(K_RAW, H_RAW), (H_RAW, H_RAW), (H_RAW, H_RAW), (H_RAW, N_RAW)]
    pad_sizes = [(K_RAW, H_PAD), (H_PAD, H_PAD), (H_PAD, H_PAD), (H_PAD, N_PAD)]
    params = {}
    for i, ((fi, fo), (pi, po)) in enumerate(zip(raw_sizes, pad_sizes), start=1):
        key, kw, kb = jax.random.split(key, 3)
        bound = 1.0 / jnp.sqrt(fi)
        w = jax.random.uniform(kw, (fi, fo), jnp.float32, -bound, bound)
        b = jax.random.uniform(kb, (1, fo), jnp.float32, -bound, bound)
        params[f"w{i}"] = jnp.pad(
            w, ((0, pi - fi), (0, po - fo))).astype(jnp.bfloat16)
        params[f"b{i}"] = jnp.pad(b, ((0, 0), (0, po - fo)))
    return params


def net_reference(x, params):
    """Plain-JAX reference of the same bf16-operand / f32-accumulated forward."""
    xb = x.astype(jnp.bfloat16)
    h = jnp.maximum(jnp.dot(xb, params["w1"],
                            preferred_element_type=jnp.float32) + params["b1"], 0.0)
    h = jnp.maximum(jnp.dot(h.astype(jnp.bfloat16), params["w2"],
                            preferred_element_type=jnp.float32) + params["b2"], 0.0)
    h = jnp.maximum(jnp.dot(h.astype(jnp.bfloat16), params["w3"],
                            preferred_element_type=jnp.float32) + params["b3"], 0.0)
    logits = jnp.dot(h.astype(jnp.bfloat16), params["w4"],
                     preferred_element_type=jnp.float32) + params["b4"]
    return jax.nn.log_softmax(logits[:, :N_RAW], axis=-1)


if __name__ == "__main__":
    key = jax.random.PRNGKey(0)
    kx, kp = jax.random.split(key)
    B = 2
    x = jax.random.normal(kx, (B, K_RAW), jnp.float32)
    params = init_params(kp)

    out = jax.block_until_ready(net_forward(x, params))

    assert out.shape == (B, N_RAW)
    # log_softmax rows must exp-sum to 1
    row_sums = jnp.exp(out).sum(axis=1)
    assert jnp.allclose(row_sums, jnp.ones((B,)), atol=1e-4)
    # matches a plain-JAX reference of the same forward pass
    ref = net_reference(x, params)
    assert jnp.allclose(out, ref, atol=5e-3, rtol=5e-3)
    print("KERNEL_OK")
</pallas_src>

<mosaic_0001>
module attributes {stable_mosaic.version = 11 : i64} {
  func.func @mlp_kernel(%arg0: i32, %arg1: memref<8x625xf32, #tpu.memory_space<vmem>>, %arg2: memref<625x128xbf16, #tpu.memory_space<vmem>>, %arg3: memref<1x128xf32, #tpu.memory_space<vmem>>, %arg4: memref<128x128xbf16, #tpu.memory_space<vmem>>, %arg5: memref<1x128xf32, #tpu.memory_space<vmem>>, %arg6: memref<128x128xbf16, #tpu.memory_space<vmem>>, %arg7: memref<1x128xf32, #tpu.memory_space<vmem>>, %arg8: memref<128x128xbf16, #tpu.memory_space<vmem>>, %arg9: memref<1x128xf32, #tpu.memory_space<vmem>>, %arg10: memref<8x10xf32, #tpu.memory_space<vmem>>) attributes {dimension_semantics = [#tpu.dimension_semantics<parallel>], iteration_bounds = array<i64: 1>, scalar_prefetch = 0 : i64, scratch_operands = 0 : i64, tpu.core_type = #tpu.core_type<tc>, window_params = [{transform_indices = @transform_0, window_bounds = array<i64: 8, 625>}, {pipeline_mode = #tpu.pipeline_mode<synchronous>, transform_indices = @transform_1, window_bounds = array<i64: 625, 128>}, {pipeline_mode = #tpu.pipeline_mode<synchronous>, transform_indices = @transform_2, window_bounds = array<i64: 1, 128>}, {pipeline_mode = #tpu.pipeline_mode<synchronous>, transform_indices = @transform_3, window_bounds = array<i64: 128, 128>}, {pipeline_mode = #tpu.pipeline_mode<synchronous>, transform_indices = @transform_4, window_bounds = array<i64: 1, 128>}, {pipeline_mode = #tpu.pipeline_mode<synchronous>, transform_indices = @transform_5, window_bounds = array<i64: 128, 128>}, {pipeline_mode = #tpu.pipeline_mode<synchronous>, transform_indices = @transform_6, window_bounds = array<i64: 1, 128>}, {pipeline_mode = #tpu.pipeline_mode<synchronous>, transform_indices = @transform_7, window_bounds = array<i64: 128, 128>}, {pipeline_mode = #tpu.pipeline_mode<synchronous>, transform_indices = @transform_8, window_bounds = array<i64: 1, 128>}, {transform_indices = @transform_9, window_bounds = array<i64: 8, 10>}]} {
    %c0 = arith.constant 0 : index
    %c0_0 = arith.constant 0 : index
    %0 = vector.load %arg1[%c0, %c0_0] : memref<8x625xf32, #tpu.memory_space<vmem>>, vector<8x625xf32>
    %1 = arith.truncf %0 : vector<8x625xf32> to vector<8x625xbf16>
    %c0_1 = arith.constant 0 : index
    %c0_2 = arith.constant 0 : index
    %2 = vector.load %arg2[%c0_1, %c0_2] : memref<625x128xbf16, #tpu.memory_space<vmem>>, vector<625x128xbf16>
    %cst = arith.constant dense<0.000000e+00> : vector<8x128xf32>
    %3 = tpu.matmul %1, %2, %cst {dimension_numbers = #tpu.dot_dimension_numbers<[1], [0], [0], [1], [0, 0, 1, 1], [], []>} : vector<8x625xbf16>, vector<625x128xbf16>, vector<8x128xf32> -> vector<8x128xf32>
    %c0_3 = arith.constant 0 : index
    %c0_4 = arith.constant 0 : index
    %4 = vector.load %arg3[%c0_3, %c0_4] : memref<1x128xf32, #tpu.memory_space<vmem>>, vector<1x128xf32>
    %5 = vector.broadcast %4 : vector<1x128xf32> to vector<8x128xf32>
    %6 = arith.addf %3, %5 : vector<8x128xf32>
    %cst_5 = arith.constant 0.000000e+00 : f32
    %7 = vector.broadcast %cst_5 : f32 to vector<8x128xf32>
    %8 = arith.maximumf %6, %7 : vector<8x128xf32>
    %9 = arith.truncf %8 : vector<8x128xf32> to vector<8x128xbf16>
    %c0_6 = arith.constant 0 : index
    %c0_7 = arith.constant 0 : index
    %10 = vector.load %arg4[%c0_6, %c0_7] : memref<128x128xbf16, #tpu.memory_space<vmem>>, vector<128x128xbf16>
    %cst_8 = arith.constant dense<0.000000e+00> : vector<8x128xf32>
    %11 = tpu.matmul %9, %10, %cst_8 {dimension_numbers = #tpu.dot_dimension_numbers<[1], [0], [0], [1], [0, 0, 1, 1], [], []>} : vector<8x128xbf16>, vector<128x128xbf16>, vector<8x128xf32> -> vector<8x128xf32>
    %c0_9 = arith.constant 0 : index
    %c0_10 = arith.constant 0 : index
    %12 = vector.load %arg5[%c0_9, %c0_10] : memref<1x128xf32, #tpu.memory_space<vmem>>, vector<1x128xf32>
    %13 = vector.broadcast %12 : vector<1x128xf32> to vector<8x128xf32>
    %14 = arith.addf %11, %13 : vector<8x128xf32>
    %cst_11 = arith.constant 0.000000e+00 : f32
    %15 = vector.broadcast %cst_11 : f32 to vector<8x128xf32>
    %16 = arith.maximumf %14, %15 : vector<8x128xf32>
    %17 = arith.truncf %16 : vector<8x128xf32> to vector<8x128xbf16>
    %c0_12 = arith.constant 0 : index
    %c0_13 = arith.constant 0 : index
    %18 = vector.load %arg6[%c0_12, %c0_13] : memref<128x128xbf16, #tpu.memory_space<vmem>>, vector<128x128xbf16>
    %cst_14 = arith.constant dense<0.000000e+00> : vector<8x128xf32>
    %19 = tpu.matmul %17, %18, %cst_14 {dimension_numbers = #tpu.dot_dimension_numbers<[1], [0], [0], [1], [0, 0, 1, 1], [], []>} : vector<8x128xbf16>, vector<128x128xbf16>, vector<8x128xf32> -> vector<8x128xf32>
    %c0_15 = arith.constant 0 : index
    %c0_16 = arith.constant 0 : index
    %20 = vector.load %arg7[%c0_15, %c0_16] : memref<1x128xf32, #tpu.memory_space<vmem>>, vector<1x128xf32>
    %21 = vector.broadcast %20 : vector<1x128xf32> to vector<8x128xf32>
    %22 = arith.addf %19, %21 : vector<8x128xf32>
    %cst_17 = arith.constant 0.000000e+00 : f32
    %23 = vector.broadcast %cst_17 : f32 to vector<8x128xf32>
    %24 = arith.maximumf %22, %23 : vector<8x128xf32>
    %25 = arith.truncf %24 : vector<8x128xf32> to vector<8x128xbf16>
    %c0_18 = arith.constant 0 : index
    %c0_19 = arith.constant 0 : index
    %26 = vector.load %arg8[%c0_18, %c0_19] : memref<128x128xbf16, #tpu.memory_space<vmem>>, vector<128x128xbf16>
    %cst_20 = arith.constant dense<0.000000e+00> : vector<8x128xf32>
    %27 = tpu.matmul %25, %26, %cst_20 {dimension_numbers = #tpu.dot_dimension_numbers<[1], [0], [0], [1], [0, 0, 1, 1], [], []>} : vector<8x128xbf16>, vector<128x128xbf16>, vector<8x128xf32> -> vector<8x128xf32>
    %c0_21 = arith.constant 0 : index
    %c0_22 = arith.constant 0 : index
    %28 = vector.load %arg9[%c0_21, %c0_22] : memref<1x128xf32, #tpu.memory_space<vmem>>, vector<1x128xf32>
    %29 = vector.broadcast %28 : vector<1x128xf32> to vector<8x128xf32>
    %30 = arith.addf %27, %29 : vector<8x128xf32>
    %31 = tpu.iota {dimensions = array<i32: 1>} : vector<8x128xi32>
    %c10_i32 = arith.constant 10 : i32
    %32 = vector.broadcast %c10_i32 : i32 to vector<8x128xi32>
    %33 = arith.cmpi slt, %31, %32 : vector<8x128xi32>
    %cst_23 = arith.constant -1.000000e+30 : f32
    %34 = vector.broadcast %cst_23 : f32 to vector<8x128xf32>
    %35 = arith.select %33, %30, %34 : vector<8x128xi1>, vector<8x128xf32>
    %cst_24 = arith.constant dense<0xFF800000> : vector<8xf32>
    %36 = vector.multi_reduction <maximumf>, %35, %cst_24 [1] : vector<8x128xf32> to vector<8xf32>
    %37 = vector.shape_cast %36 : vector<8xf32> to vector<8x1xf32>
    %38 = vector.broadcast %37 : vector<8x1xf32> to vector<8x128xf32>
    %39 = arith.subf %35, %38 : vector<8x128xf32>
    %40 = math.exp %39 : vector<8x128xf32>
    %cst_25 = arith.constant dense<0.000000e+00> : vector<8xf32>
    %41 = vector.multi_reduction <add>, %40, %cst_25 [1] : vector<8x128xf32> to vector<8xf32>
    %42 = vector.shape_cast %41 : vector<8xf32> to vector<8x1xf32>
    %43 = math.log %42 : vector<8x1xf32>
    %44 = vector.broadcast %43 : vector<8x1xf32> to vector<8x128xf32>
    %45 = arith.subf %39, %44 : vector<8x128xf32>
    %46 = vector.extract_strided_slice %45 {offsets = [0, 0], sizes = [8, 10], strides = [1, 1]} : vector<8x128xf32> to vector<8x10xf32>
    %c0_26 = arith.constant 0 : index
    %c0_27 = arith.constant 0 : index
    %47 = vector.load %arg10[%c0_26, %c0_27] : memref<8x10xf32, #tpu.memory_space<vmem>>, vector<8x10xf32>
    tpu.vector_store %arg10[%c0_26, %c0_27], %46 {strides = array<i32>} : memref<8x10xf32, #tpu.memory_space<vmem>>, vector<8x10xf32>,
    return
  }
  func.func @transform_0(%arg0: i32) -> (i32, i32) {
    %c0_i32 = arith.constant 0 : i32
    %c0_i32_0 = arith.constant 0 : i32
    return %arg0, %c0_i32 : i32, i32
  }
  func.func @transform_1(%arg0: i32) -> (i32, i32) {
    %c0_i32 = arith.constant 0 : i32
    %c0_i32_0 = arith.constant 0 : i32
    %c0_i32_1 = arith.constant 0 : i32
    return %c0_i32, %c0_i32_0 : i32, i32
  }
  func.func @transform_2(%arg0: i32) -> (i32, i32) {
    %c0_i32 = arith.constant 0 : i32
    %c0_i32_0 = arith.constant 0 : i32
    %c0_i32_1 = arith.constant 0 : i32
    return %c0_i32, %c0_i32_0 : i32, i32
  }
  func.func @transform_3(%arg0: i32) -> (i32, i32) {
    %c0_i32 = arith.constant 0 : i32
    %c0_i32_0 = arith.constant 0 : i32
    %c0_i32_1 = arith.constant 0 : i32
    return %c0_i32, %c0_i32_0 : i32, i32
  }
  func.func @transform_4(%arg0: i32) -> (i32, i32) {
    %c0_i32 = arith.constant 0 : i32
    %c0_i32_0 = arith.constant 0 : i32
    %c0_i32_1 = arith.constant 0 : i32
    return %c0_i32, %c0_i32_0 : i32, i32
  }
  func.func @transform_5(%arg0: i32) -> (i32, i32) {
    %c0_i32 = arith.constant 0 : i32
    %c0_i32_0 = arith.constant 0 : i32
    %c0_i32_1 = arith.constant 0 : i32
    return %c0_i32, %c0_i32_0 : i32, i32
  }
  func.func @transform_6(%arg0: i32) -> (i32, i32) {
    %c0_i32 = arith.constant 0 : i32
    %c0_i32_0 = arith.constant 0 : i32
    %c0_i32_1 = arith.constant 0 : i32
    return %c0_i32, %c0_i32_0 : i32, i32
  }
  func.func @transform_7(%arg0: i32) -> (i32, i32) {
    %c0_i32 = arith.constant 0 : i32
    %c0_i32_0 = arith.constant 0 : i32
    %c0_i32_1 = arith.constant 0 : i32
    return %c0_i32, %c0_i32_0 : i32, i32
  }
  func.func @transform_8(%arg0: i32) -> (i32, i32) {
    %c0_i32 = arith.constant 0 : i32
    %c0_i32_0 = arith.constant 0 : i32
    %c0_i32_1 = arith.constant 0 : i32
    return %c0_i32, %c0_i32_0 : i32, i32
  }
  func.func @transform_9(%arg0: i32) -> (i32, i32) {
    %c0_i32 = arith.constant 0 : i32
    %c0_i32_0 = arith.constant 0 : i32
    return %arg0, %c0_i32 : i32, i32
  }
}

</mosaic_0001>

<bundles_post_ra>
// kernel: net_forward.1
= control target key start
LH: loop header
LB: loop body
LE: loop exit
PB: predicated region body
PF: predicated region fallthrough
CT: control target
= control target key end

     0   :  { %14 = vsyncpa [#allocation3], 0  ;;  %s1304_s0 = inlined_call_operand.vmem [shape: f32[8,625], index: 0, kind: input, shape index: {}]   ;;  %s1305_s1 = inlined_call_operand.hbm [shape: bf16[625,128], index: 1, kind: input, shape index: {}]   ;;  %s1306_s2 = inlined_call_operand.vmem [shape: f32[1,128], index: 2, kind: input, shape index: {}]   ;;  %s1307_s3 = inlined_call_operand.hbm [shape: bf16[128,128], index: 3, kind: input, shape index: {}]   ;;  %s1308_s4 = inlined_call_operand.vmem [shape: f32[1,128], index: 4, kind: input, shape index: {}]   ;;  %s1309_s5 = inlined_call_operand.hbm [shape: bf16[128,128], index: 5, kind: input, shape index: {}]   ;;  %s1310_s6 = inlined_call_operand.vmem [shape: f32[1,128], index: 6, kind: input, shape index: {}]   ;;  %s1311_s7 = inlined_call_operand.hbm [shape: bf16[128,128], index: 7, kind: input, shape index: {}]   ;;  %s1312_s8 = inlined_call_operand.vmem [shape: f32[1,128], index: 8, kind: input, shape index: {}]   ;;  %s1313_s9 = inlined_call_operand.vmem [shape: f32[8,10], index: 9, kind: output, shape index: {}]  }
   0x1   :  { %15 = vsyncpa [#allocation5], 0 }
   0x2   :  { %16 = vsyncpa [#allocation8], 0  ;;  %s38_s11 = sshll.u32 %s1307_s3, 4  ;;  %s1205_s12 = smov [#allocation4]   ;;  %s39_s11 = int_to_ptr.hbm [resolvable:$true] %s38_s11 }
   0x3   :  { %s40_s13 = sshll.u32 %s1205_s12, 4  ;;  %s23_s16 = sshll.u32 %s1305_s1, 4  ;;  %s41_s13 = int_to_ptr.vmem [resolvable:$true] %s40_s13  ;;  %s24_s16 = int_to_ptr.hbm [resolvable:$true] %s23_s16 }
   0x4   :  { %s1206_s17 = smov 64   ;;  %s1207_s18 = smov 4  }
   0x5   :  { %46 = dma.hbm_to_vmem [thread:$0]  %s39_s11, 1024, %s41_s13, [#allocation5], %s1206_s17, %s1206_s17, %s1207_s18  }
   0x6   :  { %s1208_s19 = smov [#allocation2]   ;;  %s53_s23 = sshll.u32 %s1309_s5, 4  ;;  %s54_s23 = int_to_ptr.hbm [resolvable:$true] %s53_s23 }
   0x7   :  { %s25_s20 = sshll.u32 %s1208_s19, 4  ;;  %s68_s25 = sshll.u32 %s1311_s7, 4  ;;  %s26_s20 = int_to_ptr.vmem [resolvable:$true] %s25_s20  ;;  %s69_s25 = int_to_ptr.hbm [resolvable:$true] %s68_s25 }
   0x8   :  { %31 = dma.hbm_to_vmem [thread:$0]  %s24_s16, 5056, %s26_s20, [#allocation3], %s1206_s17, %s1206_s17, %s1207_s18  }
   0x9   :  { %s1209_s26 = smov [#allocation6]   ;;  %s1210_s1 = smov [#allocation7]  }
   0xa   :  { %s55_s27 = sshll.u32 %s1209_s26, 4  ;;  %s70_s28 = sshll.u32 %s1210_s1, 4  ;;  %s56_s27 = int_to_ptr.vmem [resolvable:$true] %s55_s27  ;;  %s71_s28 = int_to_ptr.vmem [resolvable:$true] %s70_s28 }
   0xb   :  { %61 = dma.hbm_to_vmem [thread:$0]  %s54_s23, 1024, %s56_s27, [#allocation5], %s1206_s17, %s1206_s17, %s1207_s18  }
   0xc   :  { %76 = dma.hbm_to_vmem [thread:$0]  %s69_s25, 1024, %s71_s28, [#allocation8], %s1206_s17, %s1206_s17, %s1207_s18  }
   0xd   :  { %1199 = dma.done.wait [#allocation3], 5056  }
   0xe   :  { %1200 = vsyncadd [#allocation3], 4294962240 }
   0xf   :  { %1201 = dma.done.wait [#allocation5], 2048  }
  0x10   :  { %1202 = vsyncadd [#allocation5], 4294965248 }
  0x11   :  { %1203 = dma.done.wait [#allocation8], 1024  }
  0x12   :  { %1204 = vsyncadd [#allocation8], 4294966272  ;;  %v1032_v0 = vld [vmem:[#allocation2 + $0x38] sm:$0xff]  ;;  %v1031_v3 = vld [vmem:[#allocation2 + $0x30] sm:$0xff]  ;;  %vm429_vm0 = vcmask 1040384   ;;  %v1211_v30 = vmov 0  }
  0x13   :  { %v1048_v1 = vld [vmem:[#allocation2 + $0xb8] sm:$0xff]  ;;  %435 = vmatpush.bf16.msra.mxu0 %v1032_v0  ;;  %v1047_v5 = vld [vmem:[#allocation2 + $0xb0] sm:$0xff]  ;;  %v1030_v8 = vld [vmem:[#allocation2 + $0x28] sm:$0xff]  ;;  %v431_v31 = vsel %vm429_vm0, 65535, %v1211_v30  ;;  %vm425_vm1 = vcmask 924672   ;;  %vm763_vm3 = vcmask 80896  }
  0x14   :  { %v1056_v2 = vld [vmem:[#allocation2 + $0xf8] sm:$0xff]  ;;  %461 = vmatpush.bf16.msra.mxu2 %v1048_v1  ;;  %v1055_v6 = vld [vmem:[#allocation2 + $0xf0] sm:$0xff]  ;;  %v1046_v9 = vld [vmem:[#allocation2 + $0xa8] sm:$0xff] }
  0x15   :  { %v1040_v4 = vld [vmem:[#allocation2 + $0x78] sm:$0xff]  ;;  %474 = vmatpush.bf16.msra.mxu3 %v1056_v2  ;;  %v1039_v7 = vld [vmem:[#allocation2 + $0x70] sm:$0xff]  ;;  %v1054_v10 = vld [vmem:[#allocation2 + $0xe8] sm:$0xff] }
  0x16   :  { %448 = vmatpush.bf16.msra.mxu1 %v1040_v4  ;;  %v1038_v11 = vld [vmem:[#allocation2 + $0x68] sm:$0xff]  ;;  %v1029_v12 = vld [vmem:[#allocation2 + $0x20] sm:$0xff]  ;;  %v1028_v16 = vld [vmem:[#allocation2 + $0x18] sm:$0xff] }
  0x17   :  { %436 = vmatpush.bf16.msra.mxu0 %v1031_v3  ;;  %v1045_v13 = vld [vmem:[#allocation2 + $0xa0] sm:$0xff]  ;;  %v1044_v17 = vld [vmem:[#allocation2 + $0x98] sm:$0xff]  ;;  %v1027_v21 = vld [vmem:[#allocation2 + $0x10] sm:$0xff] }
  0x18   :  { %462 = vmatpush.bf16.msra.mxu2 %v1047_v5  ;;  %v1053_v14 = vld [vmem:[#allocation2 + $0xe0] sm:$0xff]  ;;  %v1052_v18 = vld [vmem:[#allocation2 + $0xd8] sm:$0xff]  ;;  %v1043_v23 = vld [vmem:[#allocation2 + $0x90] sm:$0xff] }
  0x19   :  { %475 = vmatpush.bf16.msra.mxu3 %v1055_v6  ;;  %v1037_v15 = vld [vmem:[#allocation2 + $0x60] sm:$0xff]  ;;  %v183_v19 = vld [vmem:[#allocation2 + $0x138] sm:$0x1]  ;;  %v1051_v24 = vld [vmem:[#allocation2 + $0xd0] sm:$0xff] }
  0x1a   :  { %449 = vmatpush.bf16.msra.mxu1 %v1039_v7  ;;  %v1036_v20 = vld [vmem:[#allocation2 + $0x58] sm:$0xff]  ;;  %v345_v22 = vunpack.c.l.b16 %v183_v19  ;;  %v1035_v25 = vld [vmem:[#allocation2 + $0x50] sm:$0xff]  ;;  %v1026_v26 = vld [vmem:[#allocation2 + $0x8] sm:$0xff] }
  0x1b   :  { %437 = vmatpush.bf16.msra.mxu0 %v1030_v8  ;;  %v1042_v28 = vld [vmem:[#allocation2 + $0x88] sm:$0xff]  ;;  %v1025_v33 = vld [vmem:[#allocation2] sm:$0xff]  ;;  %v97_v37 = vld [vmem:[%s1304_s0 + $0x10] sm:$0xff] }
  0x1c   :  { %463 = vmatpush.bf16.msra.mxu2 %v1046_v9  ;;  %v385_v27 = vpack.c.b16 %v345_v22, %v345_v22  ;;  %v1050_v29 = vld [vmem:[#allocation2 + $0xc8] sm:$0xff]  ;;  %v95_v34 = vld [vmem:[%s1304_s0] sm:$0xff]  ;;  %v98_v40 = vld [vmem:[%s1304_s0 + $0x18] sm:$0xff]  ;;  %v102_v43 = vpack.c.bf16 %v97_v37, %v97_v37 }
  0x1d   :  { %476 = vmatpush.bf16.msra.mxu3 %v1054_v10  ;;  %v1034_v32 = vld [vmem:[#allocation2 + $0x48] sm:$0xff]  ;;  %v1041_v36 = vld [vmem:[#allocation2 + $0x80] sm:$0xff]  ;;  %v100_v41 = vpack.c.bf16 %v95_v34, %v95_v34  ;;  %v1063_v44 = vld [vmem:[#allocation2 + $0x130] sm:$0xff]  ;;  %v103_v45 = vpack.c.bf16 %v98_v40, %v98_v40 }
  0x1e   :  { %450 = vmatpush.bf16.msra.mxu1 %v1038_v11  ;;  %v433_v35 = vand.u32 %v431_v31, %v385_v27  ;;  %v1049_v38 = vld [vmem:[#allocation2 + $0xc0] sm:$0xff]  ;;  %v96_v42 = vld [vmem:[%s1304_s0 + $0x8] sm:$0xff]  ;;  %v1060_v49 = vld [vmem:[#allocation2 + $0x118] sm:$0xff] }
  0x1f   :  { %438 = vmatpush.bf16.msra.mxu0 %v1029_v12  ;;  %v1033_v39 = vld [vmem:[#allocation2 + $0x40] sm:$0xff]  ;;  %v101_v46 = vpack.c.bf16 %v96_v42, %v96_v42  ;;  %v1062_v47 = vld [vmem:[#allocation2 + $0x128] sm:$0xff]  ;;  %v1059_v50 = vld [vmem:[#allocation2 + $0x110] sm:$0xff] }
  0x20   :  { %464 = vmatpush.bf16.msra.mxu2 %v1045_v13  ;;  %v1061_v48 = vld [vmem:[#allocation2 + $0x120] sm:$0xff]  ;;  %v1058_v51 = vld [vmem:[#allocation2 + $0x108] sm:$0xff]  ;;  %v1071_v55 = vld [vmem:[#allocation4 + $0x38] sm:$0xff] }
  0x21   :  { %477 = vmatpush.bf16.msra.mxu3 %v1053_v14  ;;  %v1057_v52 = vld [vmem:[#allocation2 + $0x100] sm:$0xff]  ;;  %v1070_v56 = vld [vmem:[#allocation4 + $0x30] sm:$0xff]  ;;  %v1067_v59 = vld [vmem:[#allocation4 + $0x18] sm:$0xff] }
  0x22   :  { %451 = vmatpush.bf16.msra.mxu1 %v1037_v15  ;;  %v99_v53 = vld [vmem:[%s1304_s0 + $0x20] sm:$0xff]  ;;  %v1066_v60 = vld [vmem:[#allocation4 + $0x10] sm:$0xff]  ;;  %v1079_v1 = vld [vmem:[#allocation6 + $0x38] sm:$0xff] }
  0x23   :  { %439 = vmatpush.bf16.msra.mxu0 %v1028_v16  ;;  %v104_v54 = vpack.c.bf16 %v99_v53, %v99_v53  ;;  %v1069_v57 = vld [vmem:[#allocation4 + $0x28] sm:$0xff]  ;;  %v1068_v58 = vld [vmem:[#allocation4 + $0x20] sm:$0xff]  ;;  %v1078_v3 = vld [vmem:[#allocation6 + $0x30] sm:$0xff] }
  0x24   :  { %465 = vmatpush.bf16.msra.mxu2 %v1044_v17  ;;  %v1065_v61 = vld [vmem:[#allocation4 + $0x8] sm:$0xff]  ;;  %v1064_v62 = vld [vmem:[#allocation4] sm:$0xff]  ;;  %v1075_v13 = vld [vmem:[#allocation6 + $0x18] sm:$0xff] }
  0x25   :  { %478 = vmatpush.bf16.msra.mxu3 %v1052_v18  ;;  %v1077_v7 = vld [vmem:[#allocation6 + $0x28] sm:$0xff]  ;;  %v1095_v8 = vld [vmem:[%s1306_s2] ss:$0 sm:$0xff]  ;;  %v1074_v15 = vld [vmem:[#allocation6 + $0x10] sm:$0xff] }
  0x26   :  { %452 = vmatpush.bf16.msra.mxu1 %v1036_v20  ;;  %v1076_v10 = vld [vmem:[#allocation6 + $0x20] sm:$0xff]  ;;  %v1085_v27 = vld [vmem:[#allocation7 + $0x28] sm:$0xff]  ;;  %v1082_v30 = vld [vmem:[#allocation7 + $0x10] sm:$0xff] }
  0x27   :  { %440 = vmatpush.bf16.msra.mxu0 %v1027_v21  ;;  %v1096_v31 = vld [vmem:[%s1308_s4] ss:$0 sm:$0xff]  ;;  %v1081_v37 = vld [vmem:[#allocation7 + $0x8] sm:$0xff] }
  0x28   :  { %466 = vmatpush.bf16.msra.mxu2 %v1043_v23  ;;  %v1073_v23 = vld [vmem:[#allocation6 + $0x8] sm:$0xff] }
  0x29   :  { %479 = vmatpush.bf16.msra.mxu3 %v1051_v24  ;;  %v1072_v24 = vld [vmem:[#allocation6] sm:$0xff] }
  0x2a   :  { %453 = vmatpush.bf16.msra.mxu1 %v1035_v25  ;;  %v1087_v25 = vld [vmem:[#allocation7 + $0x38] sm:$0xff] }
  0x2b   :  { %441 = vmatpush.bf16.msra.mxu0 %v1026_v26  ;;  %v1086_v26 = vld [vmem:[#allocation7 + $0x30] sm:$0xff] }
  0x2c   :  { %467 = vmatpush.bf16.msra.mxu2 %v1042_v28  ;;  %v1084_v28 = vld [vmem:[#allocation7 + $0x20] sm:$0xff] }
  0x2d   :  { %480 = vmatpush.bf16.msra.mxu3 %v1050_v29  ;;  %v1083_v29 = vld [vmem:[#allocation7 + $0x18] sm:$0xff] }
  0x2e   :  { %454 = vmatpush.bf16.msra.mxu1 %v1034_v32 }
  0x2f   :  { %442 = vmatpush.bf16.msra.mxu0 %v1025_v33 }
  0x30   :  { %468 = vmatpush.bf16.msra.mxu2 %v1041_v36 }
  0x31   :  { %481 = vmatpush.bf16.msra.mxu3 %v1049_v38  ;;  %v1080_v38 = vld [vmem:[#allocation7] sm:$0xff] }
  0x32   :  { %455 = vmatpush.bf16.msra.mxu1 %v1033_v39  ;;  %443 = vmatmul.bf16.vlgmr.msra.gmra.mxu0 %v100_v41  ;;  %v1097_v39 = vld [vmem:[%s1310_s6] ss:$0 sm:$0xff] }
  0x33   :  { %487 = vmatpush.bf16.msrb.mxu0 %v433_v35  ;;  %469 = vmatmul.bf16.vlgmr.msra.gmra.mxu2 %v102_v43 }
  0x34   :  { %482 = vmatmul.bf16.vlgmr.msra.gmra.mxu3 %v103_v45  ;;  %653 = vmatpush.bf16.msrb.mxu2 %v1079_v1  ;;  %v749_v45 = vlaneseq }
  0x35   :  { %456 = vmatmul.bf16.vlgmr.msra.gmra.mxu1 %v101_v46  ;;  %736 = vmatpush.bf16.msrb.mxu3 %v1087_v25 }
  0x36   :  { %570 = vmatpush.bf16.msrb.mxu1 %v1071_v55  ;;  %v750_v46 = vand.u32 127, %v749_v45 }
  0x37   :  { %488 = vmatpush.bf16.msrb.mxu0 %v1063_v44 }
  0x38   :  { %654 = vmatpush.bf16.msrb.mxu2 %v1078_v3  ;;  %vm751_vm2 = vcmp.lt.s32.totalorder %v750_v46, 10 }
  0x39   :  { %737 = vmatpush.bf16.msrb.mxu3 %v1086_v26 }
  0x3a   :  { %571 = vmatpush.bf16.msrb.mxu1 %v1070_v56 }
  0x3b   :  { %489 = vmatpush.bf16.msrb.mxu0 %v1062_v47  ;;  %v1098_v47 = vld [vmem:[%s1312_s8] ss:$0 sm:$0xff] }
  0x3c   :  { %655 = vmatpush.bf16.msrb.mxu2 %v1077_v7 }
  0x3d   :  { %738 = vmatpush.bf16.msrb.mxu3 %v1085_v27 }
  0x3e   :  { %572 = vmatpush.bf16.msrb.mxu1 %v1069_v57 }
  0x3f   :  { %490 = vmatpush.bf16.msrb.mxu0 %v1061_v48 }
  0x40   :  { %656 = vmatpush.bf16.msrb.mxu2 %v1076_v10 }
  0x41   :  { %739 = vmatpush.bf16.msrb.mxu3 %v1084_v28 }
  0x42   :  { %573 = vmatpush.bf16.msrb.mxu1 %v1068_v58 }
  0x43   :  { %491 = vmatpush.bf16.msrb.mxu0 %v1060_v49 }
  0x44   :  { %657 = vmatpush.bf16.msrb.mxu2 %v1075_v13 }
  0x45   :  { %740 = vmatpush.bf16.msrb.mxu3 %v1083_v29 }
  0x46   :  { %574 = vmatpush.bf16.msrb.mxu1 %v1067_v59 }
  0x47   :  { %492 = vmatpush.bf16.msrb.mxu0 %v1059_v50 }
  0x48   :  { %658 = vmatpush.bf16.msrb.mxu2 %v1074_v15 }
  0x49   :  { %741 = vmatpush.bf16.msrb.mxu3 %v1082_v30 }
  0x4a   :  { %575 = vmatpush.bf16.msrb.mxu1 %v1066_v60 }
  0x4b   :  { %493 = vmatpush.bf16.msrb.mxu0 %v1058_v51 }
  0x4c   :  { %659 = vmatpush.bf16.msrb.mxu2 %v1073_v23 }
  0x4d   :  { %742 = vmatpush.bf16.msrb.mxu3 %v1081_v37 }
  0x4e   :  { %576 = vmatpush.bf16.msrb.mxu1 %v1065_v61 }
  0x4f   :  { %494 = vmatpush.bf16.msrb.mxu0 %v1057_v52 }
  0x50   :  { %660 = vmatpush.bf16.msrb.mxu2 %v1072_v24 }
  0x51   :  { %743 = vmatpush.bf16.msrb.mxu3 %v1080_v38 }
  0x52   :  { %928 = vmatmul.msk.bf16.vlgmr.msrb.gmra.mxu0 %vm425_vm1, %v104_v54  ;;  %577 = vmatpush.bf16.msrb.mxu1 %v1064_v62 }
  0xaf   :  { %v444_v63 = vpop.f32.mrf.mxu0 }
  0xb0   :  { %v445_v11 = vadd.f32 %v1095_v8, %v444_v63 }
  0xb2   :  { %v457_v0 = vpop.f32.mrf.mxu1 }
  0xb3   :  { %v458_v14 = vadd.f32 %v457_v0, %v445_v11 }
  0xb6   :  { %v470_v2 = vpop.f32.mrf.mxu2 }
  0xb7   :  { %v446_v4 = vpop.f32.mrf.mxu0  ;;  %v483_v5 = vpop.f32.mrf.mxu3  ;;  %v471_v16 = vadd.f32 %v470_v2, %v458_v14 }
  0xb9   :  { %v484_v17 = vadd.f32 %v483_v5, %v471_v16 }
  0xba   :  { %v459_v6 = vpop.f32.mrf.mxu1 }
  0xbe   :  { %v472_v9 = vpop.f32.mrf.mxu2 }
  0xbf   :  { %v485_v12 = vpop.f32.mrf.mxu3 }
  0xcf   :  { %v496_v18 = vpop.f32.mrf.mxu0 }
  0xd0   :  { %v497_v19 = vadd.f32 %v496_v18, %v484_v17 }
  0xd2   :  { %v500_v20 = vmax.f32 %v497_v19, 0.0 }
  0xd4   :  { %v501_v21 = vpack.c.bf16 %v500_v20, %v500_v20 }
  0xd6   :  { %578 = vmatmul.bf16.vlgmr.msrb.gmra.mxu1 %v501_v21 }
  0xd7   :  { %v498_v22 = vpop.f32.mrf.mxu0 }
 0x153   :  { %v579_v32 = vpop.f32.mrf.mxu1 }
 0x154   :  { %v580_v33 = vadd.f32 %v1096_v31, %v579_v32 }
 0x156   :  { %v583_v34 = vmax.f32 %v580_v33, 0.0 }
 0x158   :  { %v584_v35 = vpack.c.bf16 %v583_v34, %v583_v34 }
 0x15a   :  { %661 = vmatmul.bf16.vlgmr.msrb.gmra.mxu2 %v584_v35 }
 0x15b   :  { %v581_v36 = vpop.f32.mrf.mxu1 }
 0x1dd   :  { %v662_v40 = vpop.f32.mrf.mxu2 }
 0x1de   :  { %v663_v41 = vadd.f32 %v1097_v39, %v662_v40 }
 0x1e0   :  { %v666_v42 = vmax.f32 %v663_v41, 0.0 }
 0x1e2   :  { %v667_v43 = vpack.c.bf16 %v666_v42, %v666_v42 }
 0x1e4   :  { %744 = vmatmul.bf16.vlgmr.msrb.gmra.mxu3 %v667_v43 }
 0x1e5   :  { %v664_v44 = vpop.f32.mrf.mxu2 }
 0x267   :  { %v745_v48 = vpop.f32.mrf.mxu3 }
 0x268   :  { %v746_v49 = vadd.f32 %v1098_v47, %v745_v48 }
 0x26a   :  { %v752_v50 = vsel %vm751_vm2, %v746_v49, -1e+30 }
 0x26b   :  { %753 = vmax.xlane.f32.xlu0 %v752_v50 }
 0x26f   :  { %v747_v51 = vpop.f32.mrf.mxu3 }
 0x2de   :  { %v754_v52 = vpop.xlane.xlu0 %753 }
 0x2df   :  { %v755_v53 = vsub.f32 %v752_v50, %v754_v52 }
 0x2e1   :  { %v756_v54 = vmul.f32 1.442695, %v755_v53 }
 0x2e3   :  { %1099 = vpow2.f32 %v756_v54 }
 0x2e9   :  { %v1100_v55 = vpop.eup %1099 }
 0x2ea   :  { %758 = vadd.xlane.f32.xlu0 %v1100_v55 }
 0x35d   :  { %v759_v56 = vpop.xlane.xlu0 %758 }
 0x35e   :  { %1101 = vlog2.f32 %v759_v56 }
 0x364   :  { %v1102_v57 = vpop.eup %1101 }
 0x365   :  { %v761_v58 = vmul.f32 0.6931472, %v1102_v57 }
 0x367   :  { %v762_v59 = vsub.f32 %v755_v53, %v761_v58 }
 0x369   :  { %764 = vst.msk [vmem:[%s1313_s9] sm:$0xff] %vm763_vm3, %v762_v59 }
 0x36a   :  { %769 = vsyncpa [#allocation3], 1 }
 0x36b   :  { %770 = vsyncpa [#allocation5], 1 }
 0x36c   :  { %771 = vsyncpa [#allocation8], 1 }

</bundles_post_ra>
